<compile_context>
chip_gen: v6e
topology: v6e:2x2x1
jax: 0.10.0
libtpu: 0.0.40
codegen_flags: <defaults>
</compile_context>

<pallas_src>
import functools

import numpy as np
import jax
import jax.numpy as jnp
from jax.experimental import pallas as pl
from jax.experimental.pallas import tpu as pltpu

ALPHA = 0.03
_LANE = 128
_VMEM_BUDGET = 48 * 1024 * 1024      # conservative: leaves headroom on v7x (64 MiB)
_MAX_NB_UNROLL = 64                  # cap on the static per-image unroll in stage 2


# ---------------------------------------------------------------------------
# Host-side constant construction (cached; numpy glue runs once per shape)
# ---------------------------------------------------------------------------
def rfft2d_freqs(h, w):
    fy = np.fft.fftfreq(h)[:, None]
    fx = np.fft.fftfreq(w)[: w // 2 + 1]
    return np.sqrt(fx * fx + fy * fy)


@functools.lru_cache(maxsize=None)
def get_scale(w):
    """Same as IFFT2.get_scale, returned as (H, Wf) float32 (assumes h == w)."""
    h = w
    freqs = rfft2d_freqs(h, w)
    scale = 1.0 / np.maximum(freqs, 1.0 / max(w, h))
    scale *= np.sqrt(w * h)
    return scale.astype(np.float32)


@functools.lru_cache(maxsize=None)
def _idft_consts(H, Wf, Wp, alpha):
    """Device-resident bf16 iDFT weights.

    CH/SH: (H, H)  unnormalized complex-ifft along H (cos / sin).
    CW/SW: (Wf,Wp) half-complex -> real iDFT along W with the Hermitian weights
           (DC/Nyquist once, other bins twice), alpha and 1/(H*W) folded in, the
           module's trailing-column crop applied (only W-1 real columns) and
           zero-padded up to Wp lanes for a lane-dense output store.
    """
    W = 2 * (Wf - 1)
    Wout = W - 1
    ang_h = 2.0 * np.pi * np.outer(np.arange(H), np.arange(H)) / H
    CH = np.cos(ang_h)
    SH = np.sin(ang_h)
    ang_w = 2.0 * np.pi * np.outer(np.arange(Wf), np.arange(Wout)) / W
    wgt = np.full((Wf, 1), 2.0)
    wgt[0, 0] = 1.0
    wgt[-1, 0] = 1.0          # even W (onesided irfft): Nyquist counted once
    norm = alpha / (H * W)
    CW = np.zeros((Wf, Wp), np.float64)
    SW = np.zeros((Wf, Wp), np.float64)
    CW[:, :Wout] = wgt * np.cos(ang_w) * norm
    SW[:, :Wout] = wgt * np.sin(ang_w) * norm
    return (jnp.asarray(CH, jnp.bfloat16), jnp.asarray(SH, jnp.bfloat16),
            jnp.asarray(CW, jnp.bfloat16), jnp.asarray(SW, jnp.bfloat16))


@functools.lru_cache(maxsize=None)
def _scale_lanes(H, Wf, nb):
    """get_scale(H) tiled to the lane-packed (H, nb*Wf) layout, cached on device."""
    s = get_scale(H)
    if s.shape != (H, Wf):
        # Inherited from the module: reset_scale(x.shape[2]) assumes square images.
        raise ValueError("scale fallback assumes square images (Wf == H//2 + 1)")
    return jnp.asarray(np.tile(s, (1, nb)) if nb > 1 else s)


# ---------------------------------------------------------------------------
# VMEM sizing / chunk selection
# ---------------------------------------------------------------------------
def _vmem_bytes(nb, H, Wf, Wp):
    f32, bf16 = 4, 2
    nl = nb * Wf
    blocks = 2 * (2 * H * nl * f32)                       # xr, xi (double-buffered)
    blocks += 2 * (H * nl * f32)                          # lane-tiled scale
    blocks += 2 * (2 * H * H * bf16 + 2 * Wf * Wp * bf16)  # CH/SH/CW/SW
    blocks += 2 * (nb * H * Wp * f32)                     # output block
    temps = 2 * H * nl * bf16                             # bf16-packed xr/xi
    temps += 2 * H * nl * f32                             # zr, zi (f32)
    temps += 2 * H * Wf * bf16 + H * Wp * f32             # per-image operands + y
    return blocks + temps


def _pick_num_chunks(BC, H, Wf, Wp):
    for nc in range(1, BC + 1):
        if BC % nc:
            continue
        nb = BC // nc
        if nb <= _MAX_NB_UNROLL and _vmem_bytes(nb, H, Wf, Wp) <= _VMEM_BUDGET:
            return nc
    return BC


# ---------------------------------------------------------------------------
# Pallas kernel: scale (f32 VPU) then irfft2 as bf16->f32 MXU matmuls
# ---------------------------------------------------------------------------
def _ifft2_kernel(xr_ref, xi_ref, scale_ref, ch_ref, sh_ref, cw_ref, sw_ref,
                  o_ref, *, nb, Wf):
    # xr/xi_ref : (H, nb*Wf) f32, nb images packed along lanes
    # scale_ref : (H, nb*Wf) f32 (per-frequency scale, lane-tiled, cached constant)
    # ch/sh_ref : (H, H)     bf16
    # cw/sw_ref : (Wf, Wp)   bf16 (alpha, 1/(H*W), Hermitian wgts, crop+pad folded)
    # o_ref     : (nb, H, Wp) f32 -- final (B*C, H, Wp) layout, lane-dense stores
    s = scale_ref[...]
    xr = (xr_ref[...] * s).astype(jnp.bfloat16)
    xi = (xi_ref[...] * s).astype(jnp.bfloat16)
    ch = ch_ref[...]
    sh = sh_ref[...]
    # Stage 1: unnormalized complex ifft along H for all nb images at once
    # (big-N matmuls: N = nb*Wf).
    zr = (jnp.dot(ch, xr, preferred_element_type=jnp.float32)
          - jnp.dot(sh, xi, preferred_element_type=jnp.float32))   # (H, nb*Wf) f32
    zi = (jnp.dot(sh, xr, preferred_element_type=jnp.float32)
          + jnp.dot(ch, xi, preferred_element_type=jnp.float32))
    cw = cw_ref[...]
    sw = sw_ref[...]
    # Stage 2: shared half-complex -> real iDFT along W, one image at a time
    # (de-kronned: no block-diagonal zeros on the MXU; writes land directly in
    # the final per-image layout).
    for j in range(nb):                       # nb is a trace-time constant
        lo, hi = j * Wf, (j + 1) * Wf
        a = zr[:, lo:hi].astype(jnp.bfloat16)   # slice in f32, then cast
        b = zi[:, lo:hi].astype(jnp.bfloat16)
        y = (jnp.dot(a, cw, preferred_element_type=jnp.float32)
             - jnp.dot(b, sw, preferred_element_type=jnp.float32))  # (H, Wp) f32
        o_ref[j] = y.astype(o_ref.dtype)


# ---------------------------------------------------------------------------
# Wrapper
# ---------------------------------------------------------------------------
def ifft2_forward(x, scale=None, alpha=ALPHA, num_chunks=None):
    """x: (B, C, H, Wf, 2) f32 -> (B, C, H, W-1) f32, W = 2*(Wf-1)."""
    B, C, H, Wf, two = x.shape
    assert two == 2
    assert H % 8 == 0, "H must be a multiple of 8 (sublane alignment)"
    W = 2 * (Wf - 1)
    Wout = W - 1
    Wp = max(_LANE, ((Wout + _LANE - 1) // _LANE) * _LANE)   # lane-dense padded width
    BC = B * C

    if num_chunks is None:
        num_chunks = _pick_num_chunks(BC, H, Wf, Wp)
    assert BC % num_chunks == 0
    nb = BC // num_chunks

    ch, sh, cw, sw = _idft_consts(H, Wf, Wp, float(alpha))

    if scale is None:
        scale_l = _scale_lanes(H, Wf, nb)
    else:
        s = jnp.squeeze(jnp.asarray(scale, jnp.float32))
        if s.ndim != 2 or s.shape[0] != H or s.shape[1] != Wf:
            scale_l = _scale_lanes(H, Wf, nb)      # mirrors IFFT2.reset_scale
        else:
            scale_l = jnp.tile(s, (1, nb)) if nb > 1 else s

    # Wrapper-side layout plumbing (one XLA copy per component, no concatenate):
    # per chunk, pack the nb images along the lane axis -> (num_chunks, H, nb*Wf).
    xr = (x[..., 0].reshape(num_chunks, nb, H, Wf)
          .transpose(0, 2, 1, 3).reshape(num_chunks, H, nb * Wf))
    xi = (x[..., 1].reshape(num_chunks, nb, H, Wf)
          .transpose(0, 2, 1, 3).reshape(num_chunks, H, nb * Wf))

    vmem_est = _vmem_bytes(nb, H, Wf, Wp)
    vmem_limit = int(min(60 * 1024 * 1024,
                         max(32 * 1024 * 1024, (vmem_est * 5) // 4)))

    # Non-zero work only (no kron zero blocks, no pad columns).
    flops = 8 * H * H * BC * Wf + 4 * H * Wf * Wout * BC
    bytes_accessed = int(2 * BC * H * Wf * 4              # xr + xi
                         + BC * H * Wf * 4                # lane-tiled scale
                         + (2 * H * H + 2 * Wf * Wp) * 2  # bf16 DFT constants
                         + BC * H * Wp * 4)               # padded output

    out = pl.pallas_call(
        functools.partial(_ifft2_kernel, nb=nb, Wf=Wf),
        out_shape=jax.ShapeDtypeStruct((BC, H, Wp), jnp.float32),
        grid_spec=pltpu.PrefetchScalarGridSpec(
            num_scalar_prefetch=0,
            grid=(num_chunks,),
            in_specs=[
                pl.BlockSpec((pl.Squeezed(), H, nb * Wf), lambda c: (c, 0, 0)),  # xr
                pl.BlockSpec((pl.Squeezed(), H, nb * Wf), lambda c: (c, 0, 0)),  # xi
                pl.BlockSpec((H, nb * Wf), lambda c: (0, 0)),                    # scale
                pl.BlockSpec((H, H), lambda c: (0, 0)),                          # CH
                pl.BlockSpec((H, H), lambda c: (0, 0)),                          # SH
                pl.BlockSpec((Wf, Wp), lambda c: (0, 0)),                        # CW
                pl.BlockSpec((Wf, Wp), lambda c: (0, 0)),                        # SW
            ],
            out_specs=pl.BlockSpec((nb, H, Wp), lambda c: (c, 0, 0)),
        ),
        compiler_params=pltpu.CompilerParams(
            dimension_semantics=("parallel",),
            vmem_limit_bytes=vmem_limit),
        cost_estimate=pl.CostEstimate(flops=flops, transcendentals=0,
                                      bytes_accessed=bytes_accessed),
    )(xr, xi, scale_l, ch, sh, cw, sw)

    # (BC, H, Wp): crop the zero pad columns; layout is already (B*C, H, .).
    return out[:, :, :Wout].reshape(B, C, H, Wout)


# ---------------------------------------------------------------------------
if __name__ == "__main__":
    B, C, w = 2, 4, 16                 # spatial size w=16 -> H=16, Wf=9, output width 15
    H, Wf = w, w // 2 + 1

    key = jax.random.PRNGKey(0)
    x = jax.random.normal(key, (B, C, H, Wf, 2), dtype=jnp.float32)

    fwd = jax.jit(ifft2_forward)
    out = jax.block_until_ready(fwd(x))

    # Reference: numpy irfft2 reproducing torch.irfft(signal_ndim=2, onesided=True)
    x_np = np.asarray(x)
    scale = get_scale(w)               # same deterministic buffer as IFFT2.__init__
    xc = (x_np[..., 0] + 1j * x_np[..., 1]) * scale[None, None, :, :]
    ref = ALPHA * np.fft.irfft2(xc, s=(H, 2 * (Wf - 1)), axes=(2, 3))[:, :, :, :-1]

    assert out.shape == (B, C, H, 2 * (Wf - 1) - 1), out.shape
    err = float(np.max(np.abs(np.asarray(out) - ref)))
    # bf16 weights / f32 accumulation: slightly looser tolerance than pure f32.
    assert np.allclose(np.asarray(out), ref, rtol=5e-3, atol=5e-3), err

    print("KERNEL_OK")
</pallas_src>

<mosaic_0001>
module attributes {stable_mosaic.version = 11 : i64} {
  func.func @_ifft2_kernel(%arg0: i32, %arg1: memref<1x16x72xf32, #tpu.memory_space<vmem>>, %arg2: memref<1x16x72xf32, #tpu.memory_space<vmem>>, %arg3: memref<16x72xf32, #tpu.memory_space<vmem>>, %arg4: memref<16x16xbf16, #tpu.memory_space<vmem>>, %arg5: memref<16x16xbf16, #tpu.memory_space<vmem>>, %arg6: memref<9x128xbf16, #tpu.memory_space<vmem>>, %arg7: memref<9x128xbf16, #tpu.memory_space<vmem>>, %arg8: memref<8x16x128xf32, #tpu.memory_space<vmem>>) attributes {dimension_semantics = [#tpu.dimension_semantics<parallel>], iteration_bounds = array<i64: 1>, scalar_prefetch = 0 : i64, scratch_operands = 0 : i64, tpu.core_type = #tpu.core_type<tc>, window_params = [{transform_indices = @transform_0, window_bounds = array<i64: 1, 16, 72>}, {transform_indices = @transform_1, window_bounds = array<i64: 1, 16, 72>}, {pipeline_mode = #tpu.pipeline_mode<synchronous>, transform_indices = @transform_2, window_bounds = array<i64: 16, 72>}, {pipeline_mode = #tpu.pipeline_mode<synchronous>, transform_indices = @transform_3, window_bounds = array<i64: 16, 16>}, {pipeline_mode = #tpu.pipeline_mode<synchronous>, transform_indices = @transform_4, window_bounds = array<i64: 16, 16>}, {pipeline_mode = #tpu.pipeline_mode<synchronous>, transform_indices = @transform_5, window_bounds = array<i64: 9, 128>}, {pipeline_mode = #tpu.pipeline_mode<synchronous>, transform_indices = @transform_6, window_bounds = array<i64: 9, 128>}, {transform_indices = @transform_7, window_bounds = array<i64: 8, 16, 128>}]} {
    %c0 = arith.constant 0 : index
    %c0_0 = arith.constant 0 : index
    %0 = vector.load %arg3[%c0, %c0_0] : memref<16x72xf32, #tpu.memory_space<vmem>>, vector<16x72xf32>
    %c0_1 = arith.constant 0 : index
    %c0_2 = arith.constant 0 : index
    %c0_3 = arith.constant 0 : index
    %1 = vector.load %arg1[%c0_1, %c0_2, %c0_3] : memref<1x16x72xf32, #tpu.memory_space<vmem>>, vector<1x16x72xf32>
    %2 = vector.shape_cast %1 : vector<1x16x72xf32> to vector<16x72xf32>
    %3 = arith.mulf %2, %0 : vector<16x72xf32>
    %4 = arith.truncf %3 : vector<16x72xf32> to vector<16x72xbf16>
    %c0_4 = arith.constant 0 : index
    %c0_5 = arith.constant 0 : index
    %c0_6 = arith.constant 0 : index
    %5 = vector.load %arg2[%c0_4, %c0_5, %c0_6] : memref<1x16x72xf32, #tpu.memory_space<vmem>>, vector<1x16x72xf32>
    %6 = vector.shape_cast %5 : vector<1x16x72xf32> to vector<16x72xf32>
    %7 = arith.mulf %6, %0 : vector<16x72xf32>
    %8 = arith.truncf %7 : vector<16x72xf32> to vector<16x72xbf16>
    %c0_7 = arith.constant 0 : index
    %c0_8 = arith.constant 0 : index
    %9 = vector.load %arg4[%c0_7, %c0_8] : memref<16x16xbf16, #tpu.memory_space<vmem>>, vector<16x16xbf16>
    %c0_9 = arith.constant 0 : index
    %c0_10 = arith.constant 0 : index
    %10 = vector.load %arg5[%c0_9, %c0_10] : memref<16x16xbf16, #tpu.memory_space<vmem>>, vector<16x16xbf16>
    %cst = arith.constant dense<0.000000e+00> : vector<16x72xf32>
    %11 = tpu.matmul %9, %4, %cst {dimension_numbers = #tpu.dot_dimension_numbers<[1], [0], [0], [1], [0, 0, 1, 1], [], []>} : vector<16x16xbf16>, vector<16x72xbf16>, vector<16x72xf32> -> vector<16x72xf32>
    %cst_11 = arith.constant dense<0.000000e+00> : vector<16x72xf32>
    %12 = tpu.matmul %10, %8, %cst_11 {dimension_numbers = #tpu.dot_dimension_numbers<[1], [0], [0], [1], [0, 0, 1, 1], [], []>} : vector<16x16xbf16>, vector<16x72xbf16>, vector<16x72xf32> -> vector<16x72xf32>
    %13 = arith.subf %11, %12 : vector<16x72xf32>
    %cst_12 = arith.constant dense<0.000000e+00> : vector<16x72xf32>
    %14 = tpu.matmul %10, %4, %cst_12 {dimension_numbers = #tpu.dot_dimension_numbers<[1], [0], [0], [1], [0, 0, 1, 1], [], []>} : vector<16x16xbf16>, vector<16x72xbf16>, vector<16x72xf32> -> vector<16x72xf32>
    %cst_13 = arith.constant dense<0.000000e+00> : vector<16x72xf32>
    %15 = tpu.matmul %9, %8, %cst_13 {dimension_numbers = #tpu.dot_dimension_numbers<[1], [0], [0], [1], [0, 0, 1, 1], [], []>} : vector<16x16xbf16>, vector<16x72xbf16>, vector<16x72xf32> -> vector<16x72xf32>
    %16 = arith.addf %14, %15 : vector<16x72xf32>
    %c0_14 = arith.constant 0 : index
    %c0_15 = arith.constant 0 : index
    %17 = vector.load %arg6[%c0_14, %c0_15] : memref<9x128xbf16, #tpu.memory_space<vmem>>, vector<9x128xbf16>
    %c0_16 = arith.constant 0 : index
    %c0_17 = arith.constant 0 : index
    %18 = vector.load %arg7[%c0_16, %c0_17] : memref<9x128xbf16, #tpu.memory_space<vmem>>, vector<9x128xbf16>
    %19 = vector.extract_strided_slice %13 {offsets = [0, 0], sizes = [16, 9], strides = [1, 1]} : vector<16x72xf32> to vector<16x9xf32>
    %20 = arith.truncf %19 : vector<16x9xf32> to vector<16x9xbf16>
    %21 = vector.extract_strided_slice %16 {offsets = [0, 0], sizes = [16, 9], strides = [1, 1]} : vector<16x72xf32> to vector<16x9xf32>
    %22 = arith.truncf %21 : vector<16x9xf32> to vector<16x9xbf16>
    %cst_18 = arith.constant dense<0.000000e+00> : vector<16x128xf32>
    %23 = tpu.matmul %20, %17, %cst_18 {dimension_numbers = #tpu.dot_dimension_numbers<[1], [0], [0], [1], [0, 0, 1, 1], [], []>} : vector<16x9xbf16>, vector<9x128xbf16>, vector<16x128xf32> -> vector<16x128xf32>
    %cst_19 = arith.constant dense<0.000000e+00> : vector<16x128xf32>
    %24 = tpu.matmul %22, %18, %cst_19 {dimension_numbers = #tpu.dot_dimension_numbers<[1], [0], [0], [1], [0, 0, 1, 1], [], []>} : vector<16x9xbf16>, vector<9x128xbf16>, vector<16x128xf32> -> vector<16x128xf32>
    %25 = arith.subf %23, %24 : vector<16x128xf32>
    %c0_20 = arith.constant 0 : index
    %c0_21 = arith.constant 0 : index
    %c0_22 = arith.constant 0 : index
    %26 = vector.load %arg8[%c0_20, %c0_21, %c0_22] : memref<8x16x128xf32, #tpu.memory_space<vmem>>, vector<1x16x128xf32>
    %27 = vector.shape_cast %26 : vector<1x16x128xf32> to vector<16x128xf32>
    %28 = vector.shape_cast %25 : vector<16x128xf32> to vector<1x16x128xf32>
    tpu.vector_store %arg8[%c0_20, %c0_21, %c0_22], %28 {strides = array<i32>} : memref<8x16x128xf32, #tpu.memory_space<vmem>>, vector<1x16x128xf32>,
    %29 = vector.extract_strided_slice %13 {offsets = [0, 9], sizes = [16, 9], strides = [1, 1]} : vector<16x72xf32> to vector<16x9xf32>
    %30 = arith.truncf %29 : vector<16x9xf32> to vector<16x9xbf16>
    %31 = vector.extract_strided_slice %16 {offsets = [0, 9], sizes = [16, 9], strides = [1, 1]} : vector<16x72xf32> to vector<16x9xf32>
    %32 = arith.truncf %31 : vector<16x9xf32> to vector<16x9xbf16>
    %cst_23 = arith.constant dense<0.000000e+00> : vector<16x128xf32>
    %33 = tpu.matmul %30, %17, %cst_23 {dimension_numbers = #tpu.dot_dimension_numbers<[1], [0], [0], [1], [0, 0, 1, 1], [], []>} : vector<16x9xbf16>, vector<9x128xbf16>, vector<16x128xf32> -> vector<16x128xf32>
    %cst_24 = arith.constant dense<0.000000e+00> : vector<16x128xf32>
    %34 = tpu.matmul %32, %18, %cst_24 {dimension_numbers = #tpu.dot_dimension_numbers<[1], [0], [0], [1], [0, 0, 1, 1], [], []>} : vector<16x9xbf16>, vector<9x128xbf16>, vector<16x128xf32> -> vector<16x128xf32>
    %35 = arith.subf %33, %34 : vector<16x128xf32>
    %c1 = arith.constant 1 : index
    %c0_25 = arith.constant 0 : index
    %c0_26 = arith.constant 0 : index
    %36 = vector.load %arg8[%c1, %c0_25, %c0_26] : memref<8x16x128xf32, #tpu.memory_space<vmem>>, vector<1x16x128xf32>
    %37 = vector.shape_cast %36 : vector<1x16x128xf32> to vector<16x128xf32>
    %38 = vector.shape_cast %35 : vector<16x128xf32> to vector<1x16x128xf32>
    tpu.vector_store %arg8[%c1, %c0_25, %c0_26], %38 {strides = array<i32>} : memref<8x16x128xf32, #tpu.memory_space<vmem>>, vector<1x16x128xf32>,
    %39 = vector.extract_strided_slice %13 {offsets = [0, 18], sizes = [16, 9], strides = [1, 1]} : vector<16x72xf32> to vector<16x9xf32>
    %40 = arith.truncf %39 : vector<16x9xf32> to vector<16x9xbf16>
    %41 = vector.extract_strided_slice %16 {offsets = [0, 18], sizes = [16, 9], strides = [1, 1]} : vector<16x72xf32> to vector<16x9xf32>
    %42 = arith.truncf %41 : vector<16x9xf32> to vector<16x9xbf16>
    %cst_27 = arith.constant dense<0.000000e+00> : vector<16x128xf32>
    %43 = tpu.matmul %40, %17, %cst_27 {dimension_numbers = #tpu.dot_dimension_numbers<[1], [0], [0], [1], [0, 0, 1, 1], [], []>} : vector<16x9xbf16>, vector<9x128xbf16>, vector<16x128xf32> -> vector<16x128xf32>
    %cst_28 = arith.constant dense<0.000000e+00> : vector<16x128xf32>
    %44 = tpu.matmul %42, %18, %cst_28 {dimension_numbers = #tpu.dot_dimension_numbers<[1], [0], [0], [1], [0, 0, 1, 1], [], []>} : vector<16x9xbf16>, vector<9x128xbf16>, vector<16x128xf32> -> vector<16x128xf32>
    %45 = arith.subf %43, %44 : vector<16x128xf32>
    %c2 = arith.constant 2 : index
    %c0_29 = arith.constant 0 : index
    %c0_30 = arith.constant 0 : index
    %46 = vector.load %arg8[%c2, %c0_29, %c0_30] : memref<8x16x128xf32, #tpu.memory_space<vmem>>, vector<1x16x128xf32>
    %47 = vector.shape_cast %46 : vector<1x16x128xf32> to vector<16x128xf32>
    %48 = vector.shape_cast %45 : vector<16x128xf32> to vector<1x16x128xf32>
    tpu.vector_store %arg8[%c2, %c0_29, %c0_30], %48 {strides = array<i32>} : memref<8x16x128xf32, #tpu.memory_space<vmem>>, vector<1x16x128xf32>,
    %49 = vector.extract_strided_slice %13 {offsets = [0, 27], sizes = [16, 9], strides = [1, 1]} : vector<16x72xf32> to vector<16x9xf32>
    %50 = arith.truncf %49 : vector<16x9xf32> to vector<16x9xbf16>
    %51 = vector.extract_strided_slice %16 {offsets = [0, 27], sizes = [16, 9], strides = [1, 1]} : vector<16x72xf32> to vector<16x9xf32>
    %52 = arith.truncf %51 : vector<16x9xf32> to vector<16x9xbf16>
    %cst_31 = arith.constant dense<0.000000e+00> : vector<16x128xf32>
    %53 = tpu.matmul %50, %17, %cst_31 {dimension_numbers = #tpu.dot_dimension_numbers<[1], [0], [0], [1], [0, 0, 1, 1], [], []>} : vector<16x9xbf16>, vector<9x128xbf16>, vector<16x128xf32> -> vector<16x128xf32>
    %cst_32 = arith.constant dense<0.000000e+00> : vector<16x128xf32>
    %54 = tpu.matmul %52, %18, %cst_32 {dimension_numbers = #tpu.dot_dimension_numbers<[1], [0], [0], [1], [0, 0, 1, 1], [], []>} : vector<16x9xbf16>, vector<9x128xbf16>, vector<16x128xf32> -> vector<16x128xf32>
    %55 = arith.subf %53, %54 : vector<16x128xf32>
    %c3 = arith.constant 3 : index
    %c0_33 = arith.constant 0 : index
    %c0_34 = arith.constant 0 : index
    %56 = vector.load %arg8[%c3, %c0_33, %c0_34] : memref<8x16x128xf32, #tpu.memory_space<vmem>>, vector<1x16x128xf32>
    %57 = vector.shape_cast %56 : vector<1x16x128xf32> to vector<16x128xf32>
    %58 = vector.shape_cast %55 : vector<16x128xf32> to vector<1x16x128xf32>
    tpu.vector_store %arg8[%c3, %c0_33, %c0_34], %58 {strides = array<i32>} : memref<8x16x128xf32, #tpu.memory_space<vmem>>, vector<1x16x128xf32>,
    %59 = vector.extract_strided_slice %13 {offsets = [0, 36], sizes = [16, 9], strides = [1, 1]} : vector<16x72xf32> to vector<16x9xf32>
    %60 = arith.truncf %59 : vector<16x9xf32> to vector<16x9xbf16>
    %61 = vector.extract_strided_slice %16 {offsets = [0, 36], sizes = [16, 9], strides = [1, 1]} : vector<16x72xf32> to vector<16x9xf32>
    %62 = arith.truncf %61 : vector<16x9xf32> to vector<16x9xbf16>
    %cst_35 = arith.constant dense<0.000000e+00> : vector<16x128xf32>
    %63 = tpu.matmul %60, %17, %cst_35 {dimension_numbers = #tpu.dot_dimension_numbers<[1], [0], [0], [1], [0, 0, 1, 1], [], []>} : vector<16x9xbf16>, vector<9x128xbf16>, vector<16x128xf32> -> vector<16x128xf32>
    %cst_36 = arith.constant dense<0.000000e+00> : vector<16x128xf32>
    %64 = tpu.matmul %62, %18, %cst_36 {dimension_numbers = #tpu.dot_dimension_numbers<[1], [0], [0], [1], [0, 0, 1, 1], [], []>} : vector<16x9xbf16>, vector<9x128xbf16>, vector<16x128xf32> -> vector<16x128xf32>
    %65 = arith.subf %63, %64 : vector<16x128xf32>
    %c4 = arith.constant 4 : index
    %c0_37 = arith.constant 0 : index
    %c0_38 = arith.constant 0 : index
    %66 = vector.load %arg8[%c4, %c0_37, %c0_38] : memref<8x16x128xf32, #tpu.memory_space<vmem>>, vector<1x16x128xf32>
    %67 = vector.shape_cast %66 : vector<1x16x128xf32> to vector<16x128xf32>
    %68 = vector.shape_cast %65 : vector<16x128xf32> to vector<1x16x128xf32>
    tpu.vector_store %arg8[%c4, %c0_37, %c0_38], %68 {strides = array<i32>} : memref<8x16x128xf32, #tpu.memory_space<vmem>>, vector<1x16x128xf32>,
    %69 = vector.extract_strided_slice %13 {offsets = [0, 45], sizes = [16, 9], strides = [1, 1]} : vector<16x72xf32> to vector<16x9xf32>
    %70 = arith.truncf %69 : vector<16x9xf32> to vector<16x9xbf16>
    %71 = vector.extract_strided_slice %16 {offsets = [0, 45], sizes = [16, 9], strides = [1, 1]} : vector<16x72xf32> to vector<16x9xf32>
    %72 = arith.truncf %71 : vector<16x9xf32> to vector<16x9xbf16>
    %cst_39 = arith.constant dense<0.000000e+00> : vector<16x128xf32>
    %73 = tpu.matmul %70, %17, %cst_39 {dimension_numbers = #tpu.dot_dimension_numbers<[1], [0], [0], [1], [0, 0, 1, 1], [], []>} : vector<16x9xbf16>, vector<9x128xbf16>, vector<16x128xf32> -> vector<16x128xf32>
    %cst_40 = arith.constant dense<0.000000e+00> : vector<16x128xf32>
    %74 = tpu.matmul %72, %18, %cst_40 {dimension_numbers = #tpu.dot_dimension_numbers<[1], [0], [0], [1], [0, 0, 1, 1], [], []>} : vector<16x9xbf16>, vector<9x128xbf16>, vector<16x128xf32> -> vector<16x128xf32>
    %75 = arith.subf %73, %74 : vector<16x128xf32>
    %c5 = arith.constant 5 : index
    %c0_41 = arith.constant 0 : index
    %c0_42 = arith.constant 0 : index
    %76 = vector.load %arg8[%c5, %c0_41, %c0_42] : memref<8x16x128xf32, #tpu.memory_space<vmem>>, vector<1x16x128xf32>
    %77 = vector.shape_cast %76 : vector<1x16x128xf32> to vector<16x128xf32>
    %78 = vector.shape_cast %75 : vector<16x128xf32> to vector<1x16x128xf32>
    tpu.vector_store %arg8[%c5, %c0_41, %c0_42], %78 {strides = array<i32>} : memref<8x16x128xf32, #tpu.memory_space<vmem>>, vector<1x16x128xf32>,
    %79 = vector.extract_strided_slice %13 {offsets = [0, 54], sizes = [16, 9], strides = [1, 1]} : vector<16x72xf32> to vector<16x9xf32>
    %80 = arith.truncf %79 : vector<16x9xf32> to vector<16x9xbf16>
    %81 = vector.extract_strided_slice %16 {offsets = [0, 54], sizes = [16, 9], strides = [1, 1]} : vector<16x72xf32> to vector<16x9xf32>
    %82 = arith.truncf %81 : vector<16x9xf32> to vector<16x9xbf16>
    %cst_43 = arith.constant dense<0.000000e+00> : vector<16x128xf32>
    %83 = tpu.matmul %80, %17, %cst_43 {dimension_numbers = #tpu.dot_dimension_numbers<[1], [0], [0], [1], [0, 0, 1, 1], [], []>} : vector<16x9xbf16>, vector<9x128xbf16>, vector<16x128xf32> -> vector<16x128xf32>
    %cst_44 = arith.constant dense<0.000000e+00> : vector<16x128xf32>
    %84 = tpu.matmul %82, %18, %cst_44 {dimension_numbers = #tpu.dot_dimension_numbers<[1], [0], [0], [1], [0, 0, 1, 1], [], []>} : vector<16x9xbf16>, vector<9x128xbf16>, vector<16x128xf32> -> vector<16x128xf32>
    %85 = arith.subf %83, %84 : vector<16x128xf32>
    %c6 = arith.constant 6 : index
    %c0_45 = arith.constant 0 : index
    %c0_46 = arith.constant 0 : index
    %86 = vector.load %arg8[%c6, %c0_45, %c0_46] : memref<8x16x128xf32, #tpu.memory_space<vmem>>, vector<1x16x128xf32>
    %87 = vector.shape_cast %86 : vector<1x16x128xf32> to vector<16x128xf32>
    %88 = vector.shape_cast %85 : vector<16x128xf32> to vector<1x16x128xf32>
    tpu.vector_store %arg8[%c6, %c0_45, %c0_46], %88 {strides = array<i32>} : memref<8x16x128xf32, #tpu.memory_space<vmem>>, vector<1x16x128xf32>,
    %89 = vector.extract_strided_slice %13 {offsets = [0, 63], sizes = [16, 9], strides = [1, 1]} : vector<16x72xf32> to vector<16x9xf32>
    %90 = arith.truncf %89 : vector<16x9xf32> to vector<16x9xbf16>
    %91 = vector.extract_strided_slice %16 {offsets = [0, 63], sizes = [16, 9], strides = [1, 1]} : vector<16x72xf32> to vector<16x9xf32>
    %92 = arith.truncf %91 : vector<16x9xf32> to vector<16x9xbf16>
    %cst_47 = arith.constant dense<0.000000e+00> : vector<16x128xf32>
    %93 = tpu.matmul %90, %17, %cst_47 {dimension_numbers = #tpu.dot_dimension_numbers<[1], [0], [0], [1], [0, 0, 1, 1], [], []>} : vector<16x9xbf16>, vector<9x128xbf16>, vector<16x128xf32> -> vector<16x128xf32>
    %cst_48 = arith.constant dense<0.000000e+00> : vector<16x128xf32>
    %94 = tpu.matmul %92, %18, %cst_48 {dimension_numbers = #tpu.dot_dimension_numbers<[1], [0], [0], [1], [0, 0, 1, 1], [], []>} : vector<16x9xbf16>, vector<9x128xbf16>, vector<16x128xf32> -> vector<16x128xf32>
    %95 = arith.subf %93, %94 : vector<16x128xf32>
    %c7 = arith.constant 7 : index
    %c0_49 = arith.constant 0 : index
    %c0_50 = arith.constant 0 : index
    %96 = vector.load %arg8[%c7, %c0_49, %c0_50] : memref<8x16x128xf32, #tpu.memory_space<vmem>>, vector<1x16x128xf32>
    %97 = vector.shape_cast %96 : vector<1x16x128xf32> to vector<16x128xf32>
    %98 = vector.shape_cast %95 : vector<16x128xf32> to vector<1x16x128xf32>
    tpu.vector_store %arg8[%c7, %c0_49, %c0_50], %98 {strides = array<i32>} : memref<8x16x128xf32, #tpu.memory_space<vmem>>, vector<1x16x128xf32>,
    return
  }
  func.func @transform_0(%arg0: i32) -> (i32, i32, i32) {
    %c0_i32 = arith.constant 0 : i32
    %c0_i32_0 = arith.constant 0 : i32
    %c0_i32_1 = arith.constant 0 : i32
    return %arg0, %c0_i32, %c0_i32_0 : i32, i32, i32
  }
  func.func @transform_1(%arg0: i32) -> (i32, i32, i32) {
    %c0_i32 = arith.constant 0 : i32
    %c0_i32_0 = arith.constant 0 : i32
    %c0_i32_1 = arith.constant 0 : i32
    return %arg0, %c0_i32, %c0_i32_0 : i32, i32, i32
  }
  func.func @transform_2(%arg0: i32) -> (i32, i32) {
    %c0_i32 = arith.constant 0 : i32
    %c0_i32_0 = arith.constant 0 : i32
    %c0_i32_1 = arith.constant 0 : i32
    return %c0_i32, %c0_i32_0 : i32, i32
  }
  func.func @transform_3(%arg0: i32) -> (i32, i32) {
    %c0_i32 = arith.constant 0 : i32
    %c0_i32_0 = arith.constant 0 : i32
    %c0_i32_1 = arith.constant 0 : i32
    return %c0_i32, %c0_i32_0 : i32, i32
  }
  func.func @transform_4(%arg0: i32) -> (i32, i32) {
    %c0_i32 = arith.constant 0 : i32
    %c0_i32_0 = arith.constant 0 : i32
    %c0_i32_1 = arith.constant 0 : i32
    return %c0_i32, %c0_i32_0 : i32, i32
  }
  func.func @transform_5(%arg0: i32) -> (i32, i32) {
    %c0_i32 = arith.constant 0 : i32
    %c0_i32_0 = arith.constant 0 : i32
    %c0_i32_1 = arith.constant 0 : i32
    return %c0_i32, %c0_i32_0 : i32, i32
  }
  func.func @transform_6(%arg0: i32) -> (i32, i32) {
    %c0_i32 = arith.constant 0 : i32
    %c0_i32_0 = arith.constant 0 : i32
    %c0_i32_1 = arith.constant 0 : i32
    return %c0_i32, %c0_i32_0 : i32, i32
  }
  func.func @transform_7(%arg0: i32) -> (i32, i32, i32) {
    %c0_i32 = arith.constant 0 : i32
    %c0_i32_0 = arith.constant 0 : i32
    %c0_i32_1 = arith.constant 0 : i32
    return %arg0, %c0_i32, %c0_i32_0 : i32, i32, i32
  }
}

</mosaic_0001>

<bundles_post_ra>
// kernel: ifft2_forward.1
= control target key start
LH: loop header
LB: loop body
LE: loop exit
PB: predicated region body
PF: predicated region fallthrough
CT: control target
= control target key end

     0   :  { %v1242_v0 = vmov 0.0   ;;  %vm1243_vm0 = vmmov 0   ;;  %vm48_vm1 = vcmask 130048   ;;  %vm241_vm2 = vcmask 1043456   ;;  %s1247_s16 = smov 101   ;;  %s1248_s17 = smov 92   ;;  %s1466_s0 = inlined_call_operand.vmem [shape: f32[1,16,72], index: 0, kind: input, shape index: {}]   ;;  %s1467_s2 = inlined_call_operand.vmem [shape: f32[16,72], index: 2, kind: input, shape index: {}]   ;;  %s1468_s1 = inlined_call_operand.vmem [shape: f32[1,16,72], index: 1, kind: input, shape index: {}]   ;;  %s1469_s3 = inlined_call_operand.vmem [shape: bf16[16,16], index: 3, kind: input, shape index: {}]   ;;  %s1470_s4 = inlined_call_operand.vmem [shape: bf16[16,16], index: 4, kind: input, shape index: {}]   ;;  %s1471_s5 = inlined_call_operand.vmem [shape: bf16[9,128], index: 5, kind: input, shape index: {}]   ;;  %s1472_s6 = inlined_call_operand.vmem [shape: bf16[9,128], index: 6, kind: input, shape index: {}]   ;;  %s1473_s7 = inlined_call_operand.vmem [shape: f32[8,16,128], index: 7, kind: output, shape index: {}]  }
   0x1   :  { %1108 = vmatprep.subr.bf16.mxu0 %v1242_v0  ;;  %1114 = vmatprep.subr.bf16.mxu1 %v1242_v0  ;;  %v27_v1 = vld [vmem:[%s1467_s2] sm:$0xff]  ;;  %v28_v2 = vld [vmem:[%s1467_s2 + $0x8] sm:$0xff]  ;;  %vm242_vm3 = vcmask 1044480   ;;  %v1244_v16 = vmov 65535   ;;  %vm237_vm4 = vcmask 72704   ;;  %s1249_s18 = smov 83  }
   0x2   :  { %v29_v3 = vld [vmem:[%s1466_s0] sm:$0xff]  ;;  %v30_v4 = vld [vmem:[%s1466_s0 + $0x8] sm:$0xff]  ;;  %1110 = vmatprep.mubr.msk.bf16.mxu0 %vm1243_vm0, %v1242_v0  ;;  %1116 = vmatprep.mubr.msk.bf16.mxu1 %vm1243_vm0, %v1242_v0  ;;  %v243_v17 = vsel %vm241_vm2, 4294967295, %v1244_v16  ;;  %s1250_s19 = smov 74   ;;  %s1251_s20 = smov 65  }
   0x3   :  { %v31_v5 = vmul.f32 %v29_v3, %v27_v1  ;;  %v34_v6 = vld [vmem:[%s1468_s1] sm:$0xff]  ;;  %v35_v7 = vld [vmem:[%s1468_s1 + $0x8] sm:$0xff]  ;;  %v32_v8 = vmul.f32 %v30_v4, %v28_v2  ;;  %v244_v18 = vsel %vm242_vm3, %v243_v17, 0 }
   0x4   :  { %v36_v9 = vmul.f32 %v34_v6, %v27_v1  ;;  %v37_v10 = vmul.f32 %v35_v7, %v28_v2  ;;  %v1238_v13 = vld [vmem:[%s1469_s3] sm:$0xff]  }
   0x5   :  { %v33_v11 = vpack.c.bf16 %v32_v8, %v31_v5  ;;  %v1239_v14 = vld [vmem:[%s1470_s4] sm:$0xff]  }
   0x6   :  { %v38_v12 = vpack.c.bf16 %v37_v10, %v36_v9  ;;  %v1240_v15 = vld [vmem:[%s1471_s5] sm:$0x1f]   ;;  %s1245_s5 = smov 110  }
   0x7   :  { %1109 = vmatpush3.bf16.msra.mxu0 %v33_v11  ;;  %v1337_v19 = vand.u32 %v1240_v15, %v244_v18  ;;  %v1241_v20 = vld [vmem:[%s1472_s6] sm:$0x1f]   ;;  %s1246_s6 = smov 119  }
   0x8   :  { %1115 = vmatpush3.bf16.msra.mxu1 %v38_v12  ;;  %1120 = vmatprep.subr.bf16.mxu0 %v1242_v0  ;;  %v1344_v21 = vand.u32 %v1241_v20, %v244_v18 }
   0x9   :  { %1126 = vmatprep.subr.bf16.mxu1 %v1242_v0 }
   0xa   :  { %1111 = vmatmul.mubr.msk.bf16.vlgmr.msra.gmra.mxu0 %vm48_vm1, %v1238_v13 }
   0xb   :  { %1117 = vmatmul.mubr.msk.bf16.vlgmr.msra.gmra.mxu1 %vm48_vm1, %v1239_v14  ;;  %1121 = vmatpush3.bf16.msra.mxu0 %v38_v12 }
   0xc   :  { %1127 = vmatpush3.bf16.msra.mxu1 %v33_v11  ;;  %1122 = vmatprep.mubr.msk.bf16.mxu0 %vm1243_vm0, %v1242_v0 }
   0xd   :  { %1128 = vmatprep.mubr.msk.bf16.mxu1 %vm1243_vm0, %v1242_v0  ;;  %1132 = vmatprep.subr.bf16.mxu0 %v1242_v0 }
   0xe   :  { %1138 = vmatprep.subr.bf16.mxu1 %v1242_v0 }
  0x12   :  { %1123 = vmatmul.mubr.msk.bf16.vlgmr.msra.gmra.mxu0 %vm48_vm1, %v1238_v13 }
  0x13   :  { %1129 = vmatmul.mubr.msk.bf16.vlgmr.msra.gmra.mxu1 %vm48_vm1, %v1239_v14  ;;  %1134 = vmatprep.mubr.msk.bf16.mxu0 %vm1243_vm0, %v1242_v0 }
  0x14   :  { %1140 = vmatprep.mubr.msk.bf16.mxu1 %vm1243_vm0, %v1242_v0  ;;  %1133 = vmatpush3.bf16.msra.mxu0 %v1337_v19 }
  0x15   :  { %1144 = vmatprep.subr.bf16.mxu0 %v1242_v0  ;;  %1139 = vmatpush3.bf16.msra.mxu1 %v1344_v21 }
  0x16   :  { %1150 = vmatprep.subr.bf16.mxu1 %v1242_v0 }
  0xca   :  { %v86_v22 = vpop.f32.mrf.mxu0 }
  0xcb   :  { %v135_v23 = vpop.f32.mrf.mxu1 }
  0xcc   :  { %v1112_v24 = vpop.f32.mrf.mxu0  ;;  %v142_v28 = vsub.f32 %v86_v22, %v135_v23 }
  0xcd   :  { %v1118_v25 = vpop.f32.mrf.mxu1 }
  0xce   :  { %v89_v26 = vpop.f32.mrf.mxu0 }
  0xcf   :  { %v138_v27 = vpop.f32.mrf.mxu1 }
  0xd0   :  { %v143_v29 = vsub.f32 %v89_v26, %v138_v27  ;;  %v1113_v30 = vpop.f32.mrf.mxu0 }
  0xd1   :  { %v1119_v31 = vpop.f32.mrf.mxu1 }
  0xd2   :  { %v230_v32 = vpack.c.bf16 %v143_v29, %v142_v28  ;;  %v178_v33 = vpop.f32.mrf.mxu0 }
  0xd3   :  { %v219_v34 = vpop.f32.mrf.mxu1 }
  0xd4   :  { %444 = vrot.lane.b32.xlu1 %v230_v32, %s1245_s5  ;;  %346 = vrot.lane.b32.xlu0 %v230_v32, %s1246_s6  ;;  %v1124_v35 = vpop.f32.mrf.mxu0  ;;  %v220_v39 = vadd.f32 %v219_v34, %v178_v33 }
  0xd5   :  { %1135 = vmatmul.mubr.msk.bf16.vlgmr.msra.gmra.mxu0 %vm237_vm4, %v230_v32  ;;  %v1130_v36 = vpop.f32.mrf.mxu1 }
  0xd6   :  { %1145 = vmatpush3.bf16.msra.mxu0 %v1337_v19  ;;  %1146 = vmatprep.mubr.msk.bf16.mxu0 %vm1243_vm0, %v1242_v0  ;;  %v181_v37 = vpop.f32.mrf.mxu0 }
  0xd7   :  { %v222_v38 = vpop.f32.mrf.mxu1  ;;  %1156 = vmatprep.subr.bf16.mxu0 %v1242_v0 }
  0xd8   :  { %v223_v40 = vadd.f32 %v222_v38, %v181_v37  ;;  %v1125_v41 = vpop.f32.mrf.mxu0 }
  0xd9   :  { %v1131_v42 = vpop.f32.mrf.mxu1 }
  0xda   :  { %v231_v43 = vpack.c.bf16 %v223_v40, %v220_v39 }
  0xdc   :  { %490 = vrot.lane.b32.xlu1 %v231_v43, %s1245_s5  ;;  %393 = vrot.lane.b32.xlu0 %v231_v43, %s1246_s6 }
  0xdd   :  { %1141 = vmatmul.mubr.msk.bf16.vlgmr.msra.gmra.mxu1 %vm237_vm4, %v231_v43 }
  0xde   :  { %1151 = vmatpush3.bf16.msra.mxu1 %v1344_v21  ;;  %1152 = vmatprep.mubr.msk.bf16.mxu1 %vm1243_vm0, %v1242_v0 }
  0xdf   :  { %1162 = vmatprep.subr.bf16.mxu1 %v1242_v0 }
  0xe0   :  { %587 = vrot.lane.b32.xlu1 %v231_v43, %s1247_s16  ;;  %541 = vrot.lane.b32.xlu0 %v230_v32, %s1247_s16 }
  0xe4   :  { %684 = vrot.lane.b32.xlu1 %v231_v43, %s1248_s17  ;;  %638 = vrot.lane.b32.xlu0 %v230_v32, %s1248_s17 }
  0xe8   :  { %781 = vrot.lane.b32.xlu1 %v231_v43, %s1249_s18  ;;  %735 = vrot.lane.b32.xlu0 %v230_v32, %s1249_s18 }
  0xec   :  { %878 = vrot.lane.b32.xlu1 %v231_v43, %s1250_s19  ;;  %832 = vrot.lane.b32.xlu0 %v230_v32, %s1250_s19 }
  0xf0   :  { %975 = vrot.lane.b32.xlu1 %v231_v43, %s1251_s20  ;;  %929 = vrot.lane.b32.xlu0 %v230_v32, %s1251_s20 }
 0x146   :  { %v347_v44 = vpop.permute.xlu0 %346  ;;  %v445_v45 = vpop.permute.xlu1 %444 }
 0x147   :  { %1147 = vmatmul.mubr.msk.bf16.vlgmr.msra.gmra.mxu0 %vm237_vm4, %v347_v44 }
 0x148   :  { %1157 = vmatpush3.bf16.msra.mxu0 %v1337_v19  ;;  %1158 = vmatprep.mubr.msk.bf16.mxu0 %vm1243_vm0, %v1242_v0 }
 0x149   :  { %1168 = vmatprep.subr.bf16.mxu0 %v1242_v0 }
 0x14e   :  { %v394_v46 = vpop.permute.xlu0 %393  ;;  %v491_v47 = vpop.permute.xlu1 %490 }
 0x14f   :  { %1153 = vmatmul.mubr.msk.bf16.vlgmr.msra.gmra.mxu1 %vm237_vm4, %v394_v46  ;;  %1159 = vmatmul.mubr.msk.bf16.vlgmr.msra.gmra.mxu0 %vm237_vm4, %v445_v45 }
 0x150   :  { %1163 = vmatpush3.bf16.msra.mxu1 %v1344_v21  ;;  %1169 = vmatpush3.bf16.msra.mxu0 %v1337_v19 }
 0x151   :  { %1170 = vmatprep.mubr.msk.bf16.mxu0 %vm1243_vm0, %v1242_v0  ;;  %1164 = vmatprep.mubr.msk.bf16.mxu1 %vm1243_vm0, %v1242_v0 }
 0x152   :  { %1174 = vmatprep.subr.bf16.mxu1 %v1242_v0  ;;  %1180 = vmatprep.subr.bf16.mxu0 %v1242_v0  ;;  %v542_v48 = vpop.permute.xlu0 %541  ;;  %v588_v49 = vpop.permute.xlu1 %587 }
 0x156   :  { %v639_v50 = vpop.permute.xlu0 %638  ;;  %v685_v51 = vpop.permute.xlu1 %684 }
 0x157   :  { %1165 = vmatmul.mubr.msk.bf16.vlgmr.msra.gmra.mxu1 %vm237_vm4, %v491_v47  ;;  %1171 = vmatmul.mubr.msk.bf16.vlgmr.msra.gmra.mxu0 %vm237_vm4, %v542_v48 }
 0x158   :  { %1175 = vmatpush3.bf16.msra.mxu1 %v1344_v21  ;;  %1181 = vmatpush3.bf16.msra.mxu0 %v1337_v19 }
 0x159   :  { %1182 = vmatprep.mubr.msk.bf16.mxu0 %vm1243_vm0, %v1242_v0  ;;  %1176 = vmatprep.mubr.msk.bf16.mxu1 %vm1243_vm0, %v1242_v0 }
 0x15a   :  { %1186 = vmatprep.subr.bf16.mxu1 %v1242_v0  ;;  %1192 = vmatprep.subr.bf16.mxu0 %v1242_v0  ;;  %v736_v52 = vpop.permute.xlu0 %735  ;;  %v782_v53 = vpop.permute.xlu1 %781 }
 0x15e   :  { %v833_v54 = vpop.permute.xlu0 %832  ;;  %v879_v55 = vpop.permute.xlu1 %878 }
 0x15f   :  { %1177 = vmatmul.mubr.msk.bf16.vlgmr.msra.gmra.mxu1 %vm237_vm4, %v588_v49  ;;  %1183 = vmatmul.mubr.msk.bf16.vlgmr.msra.gmra.mxu0 %vm237_vm4, %v639_v50 }
 0x160   :  { %1187 = vmatpush3.bf16.msra.mxu1 %v1344_v21  ;;  %1193 = vmatpush3.bf16.msra.mxu0 %v1337_v19 }
 0x161   :  { %1188 = vmatprep.mubr.msk.bf16.mxu1 %vm1243_vm0, %v1242_v0  ;;  %1194 = vmatprep.mubr.msk.bf16.mxu0 %vm1243_vm0, %v1242_v0 }
 0x162   :  { %1198 = vmatprep.subr.bf16.mxu1 %v1242_v0  ;;  %1204 = vmatprep.subr.bf16.mxu0 %v1242_v0  ;;  %v930_v56 = vpop.permute.xlu0 %929  ;;  %v976_v57 = vpop.permute.xlu1 %975 }
 0x167   :  { %1189 = vmatmul.mubr.msk.bf16.vlgmr.msra.gmra.mxu1 %vm237_vm4, %v685_v51  ;;  %1195 = vmatmul.mubr.msk.bf16.vlgmr.msra.gmra.mxu0 %vm237_vm4, %v736_v52 }
 0x168   :  { %1199 = vmatpush3.bf16.msra.mxu1 %v1344_v21  ;;  %1205 = vmatpush3.bf16.msra.mxu0 %v1337_v19 }
 0x169   :  { %1200 = vmatprep.mubr.msk.bf16.mxu1 %vm1243_vm0, %v1242_v0  ;;  %1206 = vmatprep.mubr.msk.bf16.mxu0 %vm1243_vm0, %v1242_v0 }
 0x16a   :  { %1210 = vmatprep.subr.bf16.mxu1 %v1242_v0  ;;  %1216 = vmatprep.subr.bf16.mxu0 %v1242_v0 }
 0x16f   :  { %1201 = vmatmul.mubr.msk.bf16.vlgmr.msra.gmra.mxu1 %vm237_vm4, %v782_v53  ;;  %1207 = vmatmul.mubr.msk.bf16.vlgmr.msra.gmra.mxu0 %vm237_vm4, %v833_v54 }
 0x170   :  { %1211 = vmatpush3.bf16.msra.mxu1 %v1344_v21  ;;  %1217 = vmatpush3.bf16.msra.mxu0 %v1337_v19 }
 0x171   :  { %1212 = vmatprep.mubr.msk.bf16.mxu1 %vm1243_vm0, %v1242_v0  ;;  %1218 = vmatprep.mubr.msk.bf16.mxu0 %vm1243_vm0, %v1242_v0 }
 0x172   :  { %1222 = vmatprep.subr.bf16.mxu1 %v1242_v0 }
 0x177   :  { %1213 = vmatmul.mubr.msk.bf16.vlgmr.msra.gmra.mxu1 %vm237_vm4, %v879_v55  ;;  %1219 = vmatmul.mubr.msk.bf16.vlgmr.msra.gmra.mxu0 %vm237_vm4, %v930_v56 }
 0x178   :  { %1223 = vmatpush3.bf16.msra.mxu1 %v1344_v21  ;;  %1224 = vmatprep.mubr.msk.bf16.mxu1 %vm1243_vm0, %v1242_v0 }
 0x17f   :  { %1225 = vmatmul.mubr.msk.bf16.vlgmr.msra.gmra.mxu1 %vm237_vm4, %v976_v57 }
 0x195   :  { %v282_v58 = vpop.f32.mrf.mxu0 }
 0x197   :  { %v1136_v59 = vpop.f32.mrf.mxu0 }
 0x199   :  { %v285_v60 = vpop.f32.mrf.mxu0 }
 0x19b   :  { %v1137_v61 = vpop.f32.mrf.mxu0 }
 0x19d   :  { %v334_v62 = vpop.f32.mrf.mxu1 }
 0x19e   :  { %v341_v63 = vsub.f32 %v282_v58, %v334_v62 }
 0x19f   :  { %v1142_v1 = vpop.f32.mrf.mxu1 }
 0x1a0   :  { %343 = vst [vmem:[%s1473_s7] sm:$0xff] %v341_v63 }
 0x1a1   :  { %v337_v2 = vpop.f32.mrf.mxu1 }
 0x1a2   :  { %v342_v3 = vsub.f32 %v285_v60, %v337_v2 }
 0x1a3   :  { %v1143_v4 = vpop.f32.mrf.mxu1 }
 0x1a4   :  { %344 = vst [vmem:[%s1473_s7 + $0x8] sm:$0xff] %v342_v3 }
 0x207   :  { %v385_v0 = vpop.f32.mrf.mxu0 }
 0x209   :  { %v1148_v5 = vpop.f32.mrf.mxu0 }
 0x20b   :  { %v388_v6 = vpop.f32.mrf.mxu0 }
 0x20d   :  { %v1149_v7 = vpop.f32.mrf.mxu0 }
 0x20f   :  { %v432_v8 = vpop.f32.mrf.mxu1  ;;  %v483_v9 = vpop.f32.mrf.mxu0 }
 0x210   :  { %v439_v10 = vsub.f32 %v385_v0, %v432_v8 }
 0x211   :  { %v1154_v11 = vpop.f32.mrf.mxu1  ;;  %v1160_v12 = vpop.f32.mrf.mxu0 }
 0x212   :  { %1042 = vst [vmem:[%s1473_s7 + $0x10] sm:$0xff] %v439_v10 }
 0x213   :  { %v435_v13 = vpop.f32.mrf.mxu1  ;;  %v486_v14 = vpop.f32.mrf.mxu0 }
 0x214   :  { %v440_v15 = vsub.f32 %v388_v6, %v435_v13 }
 0x215   :  { %v1155_v16 = vpop.f32.mrf.mxu1  ;;  %v1161_v17 = vpop.f32.mrf.mxu0 }
 0x216   :  { %1043 = vst [vmem:[%s1473_s7 + $0x18] sm:$0xff] %v440_v15 }
 0x217   :  { %v529_v18 = vpop.f32.mrf.mxu1  ;;  %v580_v19 = vpop.f32.mrf.mxu0 }
 0x218   :  { %v536_v20 = vsub.f32 %v483_v9, %v529_v18 }
 0x219   :  { %v1166_v21 = vpop.f32.mrf.mxu1  ;;  %v1172_v22 = vpop.f32.mrf.mxu0 }
 0x21a   :  { %1046 = vst [vmem:[%s1473_s7 + $0x20] sm:$0xff] %v536_v20 }
 0x21b   :  { %v532_v23 = vpop.f32.mrf.mxu1  ;;  %v583_v24 = vpop.f32.mrf.mxu0 }
 0x21c   :  { %v537_v25 = vsub.f32 %v486_v14, %v532_v23 }
 0x21d   :  { %v1167_v26 = vpop.f32.mrf.mxu1  ;;  %v1173_v27 = vpop.f32.mrf.mxu0 }
 0x21e   :  { %1047 = vst [vmem:[%s1473_s7 + $0x28] sm:$0xff] %v537_v25 }
 0x21f   :  { %v626_v28 = vpop.f32.mrf.mxu1  ;;  %v677_v29 = vpop.f32.mrf.mxu0 }
 0x220   :  { %v633_v30 = vsub.f32 %v580_v19, %v626_v28 }
 0x221   :  { %v1178_v31 = vpop.f32.mrf.mxu1  ;;  %v1184_v32 = vpop.f32.mrf.mxu0 }
 0x222   :  { %1050 = vst [vmem:[%s1473_s7 + $0x30] sm:$0xff] %v633_v30 }
 0x223   :  { %v629_v33 = vpop.f32.mrf.mxu1  ;;  %v680_v34 = vpop.f32.mrf.mxu0 }
 0x224   :  { %v634_v35 = vsub.f32 %v583_v24, %v629_v33 }
 0x225   :  { %v1179_v36 = vpop.f32.mrf.mxu1  ;;  %v1185_v37 = vpop.f32.mrf.mxu0 }
 0x226   :  { %1051 = vst [vmem:[%s1473_s7 + $0x38] sm:$0xff] %v634_v35 }
 0x227   :  { %v723_v38 = vpop.f32.mrf.mxu1  ;;  %v774_v39 = vpop.f32.mrf.mxu0 }
 0x228   :  { %v730_v40 = vsub.f32 %v677_v29, %v723_v38 }
 0x229   :  { %v1190_v41 = vpop.f32.mrf.mxu1  ;;  %v1196_v42 = vpop.f32.mrf.mxu0 }
 0x22a   :  { %1054 = vst [vmem:[%s1473_s7 + $0x40] sm:$0xff] %v730_v40 }
 0x22b   :  { %v726_v43 = vpop.f32.mrf.mxu1  ;;  %v777_v44 = vpop.f32.mrf.mxu0 }
 0x22c   :  { %v731_v45 = vsub.f32 %v680_v34, %v726_v43 }
 0x22d   :  { %v1191_v46 = vpop.f32.mrf.mxu1  ;;  %v1197_v47 = vpop.f32.mrf.mxu0 }
 0x22e   :  { %1055 = vst [vmem:[%s1473_s7 + $0x48] sm:$0xff] %v731_v45 }
 0x22f   :  { %v820_v48 = vpop.f32.mrf.mxu1  ;;  %v871_v49 = vpop.f32.mrf.mxu0 }
 0x230   :  { %v827_v50 = vsub.f32 %v774_v39, %v820_v48 }
 0x231   :  { %v1202_v51 = vpop.f32.mrf.mxu1  ;;  %v1208_v52 = vpop.f32.mrf.mxu0 }
 0x232   :  { %1058 = vst [vmem:[%s1473_s7 + $0x50] sm:$0xff] %v827_v50 }
 0x233   :  { %v823_v53 = vpop.f32.mrf.mxu1  ;;  %v874_v54 = vpop.f32.mrf.mxu0 }
 0x234   :  { %v828_v55 = vsub.f32 %v777_v44, %v823_v53 }
 0x235   :  { %v1203_v56 = vpop.f32.mrf.mxu1  ;;  %v1209_v57 = vpop.f32.mrf.mxu0 }
 0x236   :  { %1059 = vst [vmem:[%s1473_s7 + $0x58] sm:$0xff] %v828_v55 }
 0x237   :  { %v917_v58 = vpop.f32.mrf.mxu1  ;;  %v968_v59 = vpop.f32.mrf.mxu0 }
 0x238   :  { %v924_v60 = vsub.f32 %v871_v49, %v917_v58 }
 0x239   :  { %v1214_v61 = vpop.f32.mrf.mxu1  ;;  %v1220_v62 = vpop.f32.mrf.mxu0 }
 0x23a   :  { %1062 = vst [vmem:[%s1473_s7 + $0x60] sm:$0xff] %v924_v60 }
 0x23b   :  { %v920_v63 = vpop.f32.mrf.mxu1  ;;  %v971_v1 = vpop.f32.mrf.mxu0 }
 0x23c   :  { %v925_v2 = vsub.f32 %v874_v54, %v920_v63 }
 0x23d   :  { %v1215_v3 = vpop.f32.mrf.mxu1  ;;  %v1221_v4 = vpop.f32.mrf.mxu0 }
 0x23e   :  { %1063 = vst [vmem:[%s1473_s7 + $0x68] sm:$0xff] %v925_v2 }
 0x23f   :  { %v1014_v0 = vpop.f32.mrf.mxu1 }
 0x240   :  { %v1021_v5 = vsub.f32 %v968_v59, %v1014_v0 }
 0x241   :  { %v1226_v6 = vpop.f32.mrf.mxu1 }
 0x242   :  { %1066 = vst [vmem:[%s1473_s7 + $0x70] sm:$0xff] %v1021_v5 }
 0x243   :  { %v1017_v7 = vpop.f32.mrf.mxu1 }
 0x244   :  { %v1022_v8 = vsub.f32 %v971_v1, %v1017_v7 }
 0x245   :  { %v1227_v9 = vpop.f32.mrf.mxu1 }
 0x246   :  { %1067 = vst [vmem:[%s1473_s7 + $0x78] sm:$0xff] %v1022_v8 }

</bundles_post_ra>
